<compile_context>
chip_gen: v5e
topology: v5e:2x2
jax: 0.10.0
libtpu: 0.0.40
codegen_flags: <defaults>
</compile_context>

<pallas_src>
import functools
import math

import jax
import jax.numpy as jnp
from jax.experimental import pallas as pl
from jax.experimental.pallas import tpu as pltpu


# ----------------------------- tiling helper --------------------------------

def _seq_tile(S, pref=128):
    """Sequence/query tile: full S when small, else a multiple-of-8 divisor near 128."""
    if S <= pref:
        return S
    if S % pref == 0:
        return pref
    for t in range(pref, 7, -8):
        if S % t == 0:
            return t
    return S


# ----------------------------- Pallas kernels -------------------------------

def _qkv_proj_kernel(x_ref, w_ref, b_ref, o_ref):
    # x: (TS, d_model), w: (d_model, dim), b: (1, dim) -> o: (TS, dim)
    o_ref[...] = (
        jnp.dot(x_ref[...], w_ref[...], preferred_element_type=jnp.float32)
        + b_ref[...]
    )


def _out_proj_kernel(x_ref, w_ref, b_ref, o_ref):
    # Fused combine_heads + w_o: per-head contribution accumulated into the
    # (TS, d_model) output block, which stays resident in VMEM across the
    # last ("arbitrary") head grid axis. Output stores are d_model-lane-dense.
    h = pl.program_id(2)
    contrib = jnp.dot(x_ref[...], w_ref[...], preferred_element_type=jnp.float32)

    @pl.when(h == 0)
    def _():
        o_ref[...] = contrib + b_ref[...]

    @pl.when(h > 0)
    def _():
        o_ref[...] = o_ref[...] + contrib


def _attn_kernel(q_ref, k_ref, v_ref, rel_ref, mask_ref, out_ref, scores_ref,
                 *, inv_scale):
    # q: (TQ, d), k/v: (S, d), rel: (TQ, S) = mat_qr*inv_scale + rel_bias, mask: (TQ, S)
    q = q_ref[...]
    k = k_ref[...]
    v = v_ref[...]

    s = jnp.dot(q, k.T, preferred_element_type=jnp.float32) * inv_scale + rel_ref[...]
    s = jnp.where(mask_ref[...] == 0, jnp.float32(-1e9), s)   # masked_fill semantics
    scores_ref[...] = s

    # softmax over keys (dropout = identity in eval mode)
    m = jnp.max(s, axis=-1, keepdims=True)
    e = jnp.exp(s - m)
    p = e / jnp.sum(e, axis=-1, keepdims=True)

    out_ref[...] = jnp.dot(p, v, preferred_element_type=jnp.float32)


# ----------------------------- wrappers --------------------------------------

def project_split_heads(x, w, b, num_heads):
    """x:(B,S,d_model) @ w:(d_model,d_model) + b, written directly as (B,H,S,dim).

    Head split is fused into the out BlockSpec via a one-time per-head weight
    layout (H, d_model, dim); no activation transposes are materialized."""
    B, S, d_model = x.shape
    H = num_heads
    dim = d_model // H
    TS = _seq_tile(S)
    n_s = S // TS
    w_h = w.reshape(d_model, H, dim).transpose(1, 0, 2)   # (H, d_model, dim)
    b_h = b.reshape(H, 1, dim)
    return pl.pallas_call(
        _qkv_proj_kernel,
        out_shape=jax.ShapeDtypeStruct((B, H, S, dim), jnp.float32),
        grid=(B, H, n_s),
        in_specs=[
            pl.BlockSpec((None, TS, d_model), lambda bb, h, s: (bb, s, 0)),
            pl.BlockSpec((None, d_model, dim), lambda bb, h, s: (h, 0, 0)),
            pl.BlockSpec((None, 1, dim), lambda bb, h, s: (h, 0, 0)),
        ],
        out_specs=pl.BlockSpec((None, None, TS, dim), lambda bb, h, s: (bb, h, s, 0)),
        compiler_params=pltpu.CompilerParams(
            dimension_semantics=("parallel", "parallel", "parallel")),
    )(x, w_h, b_h)


def combine_heads_project(attn, w_o, b_o):
    """attn:(B,H,S,dim) -> (B,S,d_model). combine_heads + w_o fused as a reduction
    over the head grid axis with a resident lane-dense output block."""
    B, H, S, dim = attn.shape
    d_model = H * dim
    TS = _seq_tile(S)
    n_s = S // TS
    w_h = w_o.reshape(H, dim, d_model)
    b2 = b_o.reshape(1, d_model)
    return pl.pallas_call(
        _out_proj_kernel,
        out_shape=jax.ShapeDtypeStruct((B, S, d_model), jnp.float32),
        grid=(B, n_s, H),
        in_specs=[
            pl.BlockSpec((None, None, TS, dim), lambda bb, s, h: (bb, h, s, 0)),
            pl.BlockSpec((None, dim, d_model), lambda bb, s, h: (h, 0, 0)),
            pl.BlockSpec((1, d_model), lambda bb, s, h: (0, 0)),
        ],
        out_specs=pl.BlockSpec((None, TS, d_model), lambda bb, s, h: (bb, s, 0)),
        compiler_params=pltpu.CompilerParams(
            dimension_semantics=("parallel", "parallel", "arbitrary")),
    )(attn, w_h, b2)


def pallas_attention_relEB(q, k, v, rel_add, mask, dim_qkv):
    """q,k,v: (B,H,S,d); rel_add: (B,H,S,S) (= mat_qr/scale + rel_bias); mask: (S,S)."""
    B, H, S, d = q.shape
    inv_scale = 1.0 / math.sqrt(float(dim_qkv))
    TQ = _seq_tile(S)
    n_q = S // TQ
    kernel = functools.partial(_attn_kernel, inv_scale=inv_scale)

    out, scores = pl.pallas_call(
        kernel,
        out_shape=(
            jax.ShapeDtypeStruct((B, H, S, d), jnp.float32),
            jax.ShapeDtypeStruct((B, H, S, S), jnp.float32),
        ),
        grid=(B, H, n_q),
        in_specs=[
            pl.BlockSpec((None, None, TQ, d), lambda b, h, qi: (b, h, qi, 0)),   # Q tile
            pl.BlockSpec((None, None, S, d), lambda b, h, qi: (b, h, 0, 0)),     # K (resident over qi)
            pl.BlockSpec((None, None, S, d), lambda b, h, qi: (b, h, 0, 0)),     # V (resident over qi)
            pl.BlockSpec((None, None, TQ, S), lambda b, h, qi: (b, h, qi, 0)),   # rel_add tile
            pl.BlockSpec((TQ, S), lambda b, h, qi: (qi, 0)),                     # mask tile
        ],
        out_specs=(
            pl.BlockSpec((None, None, TQ, d), lambda b, h, qi: (b, h, qi, 0)),
            pl.BlockSpec((None, None, TQ, S), lambda b, h, qi: (b, h, qi, 0)),
        ),
        compiler_params=pltpu.CompilerParams(
            dimension_semantics=("parallel", "parallel", "parallel")),
    )(q, k, v, rel_add, mask)
    return out, scores


def mha_relEB_forward(params, Q, K, V, relative_ids, mask):
    """Full forward pass of MultiHeadAttention_relEB (eval mode)."""
    d_model = params["d_model"]
    H = params["num_heads"]
    dim = d_model // H
    B, S, _ = Q.shape
    inv_scale = 1.0 / math.sqrt(float(dim))

    q = project_split_heads(Q, params["w_q"], params["b_q"], H)   # (B,H,S,dim)
    k = project_split_heads(K, params["w_k"], params["b_k"], H)
    v = project_split_heads(V, params["w_v"], params["b_v"], H)

    # Relative-position term via gather-after-matmul (plain-JAX glue):
    #   R = q @ rel_emb^T : (B,H,S,vocab)  (tiny, MXU-friendly)
    #   mat_qr[b,h,q,k]   = R[b,h,q, relative_ids[q,k]]
    # This replaces the (S,S,dim) rp_k tensor and the in-kernel VPU reduction.
    rel_emb = params["rel_emb"]                              # (vocab, dim)
    R = jnp.einsum("bhqd,vd->bhqv", q, rel_emb)              # (B,H,S,vocab)
    idx = jnp.broadcast_to(relative_ids[None, None], (B, H, S, S))
    mat_qr = jnp.take_along_axis(R, idx, axis=-1)            # (B,H,S,S)
    rel_bias2d = params["rel_bias"][relative_ids, 0]         # (S,S)
    rel_add = mat_qr * inv_scale + rel_bias2d[None, None]    # (B,H,S,S)
    # TODO(synk): move this vocab-wide gather into the attention kernel (lane gather on
    # the per-tile (TQ, vocab) q@rel_emb^T result) to drop the (B,H,S,S) rel_add HBM trip.

    attn_out, attn_scores = pallas_attention_relEB(q, k, v, rel_add, mask, dim)

    output = combine_heads_project(attn_out, params["w_o"], params["b_o"])
    return output, attn_scores


# ----------------------------- reference (plain JAX) -------------------------

def reference_forward(params, Q, K, V, relative_ids, mask):
    d_model = params["d_model"]
    H = params["num_heads"]
    dim = d_model // H
    B, S, _ = Q.shape

    def lin(x, w, b):
        return x @ w + b

    def split(x):
        return x.reshape(B, S, H, dim).transpose(0, 2, 1, 3)

    q = split(lin(Q, params["w_q"], params["b_q"]))
    k = split(lin(K, params["w_k"], params["b_k"]))
    v = split(lin(V, params["w_v"], params["b_v"]))

    mat_qk = jnp.einsum("bhqd,bhkd->bhqk", q, k)
    rp_k = params["rel_emb"][relative_ids]
    mat_qr = jnp.einsum("bhqd,qkd->bhqk", q, rp_k)
    scores = (mat_qk + mat_qr) / math.sqrt(dim)
    scores = scores + params["rel_bias"][relative_ids][..., 0]
    scores = jnp.where(mask == 0, -1e9, scores)
    probs = jax.nn.softmax(scores, axis=-1)
    out = jnp.einsum("bhqk,bhkd->bhqd", probs, v)
    out = out.transpose(0, 2, 1, 3).reshape(B, S, d_model)
    out = lin(out, params["w_o"], params["b_o"])
    return out, scores


# ----------------------------- parameter init --------------------------------

def init_params(key, d_model, num_heads):
    dim = d_model // num_heads
    max_rel = 16
    vocab = 2 * max_rel + 1
    ks = jax.random.split(key, 10)
    xavier_lim = math.sqrt(6.0 / (d_model + d_model))
    bias_lim = 1.0 / math.sqrt(d_model)

    def lin_w(k):
        return jax.random.uniform(k, (d_model, d_model), jnp.float32,
                                  -xavier_lim, xavier_lim)

    def lin_b(k):
        return jax.random.uniform(k, (d_model,), jnp.float32,
                                  -bias_lim, bias_lim)

    return {
        "d_model": d_model,
        "num_heads": num_heads,
        "w_q": lin_w(ks[0]), "b_q": lin_b(ks[1]),
        "w_k": lin_w(ks[2]), "b_k": lin_b(ks[3]),
        "w_v": lin_w(ks[4]), "b_v": lin_b(ks[5]),
        "w_o": lin_w(ks[6]), "b_o": lin_b(ks[7]),
        "rel_emb": jax.random.uniform(ks[8], (vocab, dim), jnp.float32, -0.05, 0.05),
        "rel_bias": jax.random.uniform(ks[9], (vocab, 1), jnp.float32, -0.05, 0.05),
        "max_relative_position": max_rel,
    }


# ----------------------------- main -------------------------------------------

if __name__ == "__main__":
    B, S, d_model, num_heads = 2, 8, 32, 4

    key = jax.random.PRNGKey(0)
    kq, kk, kv, kp = jax.random.split(key, 4)
    params = init_params(kp, d_model, num_heads)

    Q = jax.random.normal(kq, (B, S, d_model), jnp.float32)
    K = jax.random.normal(kk, (B, S, d_model), jnp.float32)
    V = jax.random.normal(kv, (B, S, d_model), jnp.float32)

    # relative_ids[i, j] = clip(j - i, -16, 16) + 16
    pos = jnp.arange(S)
    relative_ids = jnp.clip(pos[None, :] - pos[:, None],
                            -params["max_relative_position"],
                            params["max_relative_position"]) + params["max_relative_position"]
    relative_ids = relative_ids.astype(jnp.int32)

    # causal mask shared over batch and heads; masked_fill where mask == 0
    mask = jnp.tril(jnp.ones((S, S), jnp.int32))

    out, scores = mha_relEB_forward(params, Q, K, V, relative_ids, mask)
    out = jax.block_until_ready(out)
    scores = jax.block_until_ready(scores)

    ref_out, ref_scores = reference_forward(params, Q, K, V, relative_ids, mask)

    assert out.shape == (B, S, d_model)
    assert scores.shape == (B, num_heads, S, S)
    assert jnp.allclose(out, ref_out, atol=1e-3, rtol=1e-3)
    assert jnp.allclose(scores, ref_scores, atol=1e-3, rtol=1e-3)

    print("KERNEL_OK")
</pallas_src>

<mosaic_0001>
module attributes {stable_mosaic.version = 11 : i64} {
  func.func @_qkv_proj_kernel(%arg0: i32, %arg1: i32, %arg2: i32, %arg3: memref<1x8x32xf32, #tpu.memory_space<vmem>>, %arg4: memref<1x32x8xf32, #tpu.memory_space<vmem>>, %arg5: memref<1x1x8xf32, #tpu.memory_space<vmem>>, %arg6: memref<1x1x8x8xf32, #tpu.memory_space<vmem>>) attributes {dimension_semantics = [#tpu.dimension_semantics<parallel>, #tpu.dimension_semantics<parallel>, #tpu.dimension_semantics<parallel>], iteration_bounds = array<i64: 2, 4, 1>, scalar_prefetch = 0 : i64, scratch_operands = 0 : i64, tpu.core_type = #tpu.core_type<tc>, window_params = [{transform_indices = @transform_0, window_bounds = array<i64: 1, 8, 32>}, {transform_indices = @transform_1, window_bounds = array<i64: 1, 32, 8>}, {transform_indices = @transform_2, window_bounds = array<i64: 1, 1, 8>}, {transform_indices = @transform_3, window_bounds = array<i64: 1, 1, 8, 8>}]} {
    %c0 = arith.constant 0 : index
    %c0_0 = arith.constant 0 : index
    %c0_1 = arith.constant 0 : index
    %0 = vector.load %arg3[%c0, %c0_0, %c0_1] : memref<1x8x32xf32, #tpu.memory_space<vmem>>, vector<1x8x32xf32>
    %1 = vector.shape_cast %0 : vector<1x8x32xf32> to vector<8x32xf32>
    %c0_2 = arith.constant 0 : index
    %c0_3 = arith.constant 0 : index
    %c0_4 = arith.constant 0 : index
    %2 = vector.load %arg4[%c0_2, %c0_3, %c0_4] : memref<1x32x8xf32, #tpu.memory_space<vmem>>, vector<1x32x8xf32>
    %3 = vector.shape_cast %2 : vector<1x32x8xf32> to vector<32x8xf32>
    %cst = arith.constant dense<0.000000e+00> : vector<8x8xf32>
    %4 = tpu.matmul %1, %3, %cst {dimension_numbers = #tpu.dot_dimension_numbers<[1], [0], [0], [1], [0, 0, 1, 1], [], []>} : vector<8x32xf32>, vector<32x8xf32>, vector<8x8xf32> -> vector<8x8xf32>
    %c0_5 = arith.constant 0 : index
    %c0_6 = arith.constant 0 : index
    %c0_7 = arith.constant 0 : index
    %5 = vector.load %arg5[%c0_5, %c0_6, %c0_7] : memref<1x1x8xf32, #tpu.memory_space<vmem>>, vector<1x1x8xf32>
    %6 = vector.shape_cast %5 : vector<1x1x8xf32> to vector<1x8xf32>
    %7 = vector.broadcast %6 : vector<1x8xf32> to vector<8x8xf32>
    %8 = arith.addf %4, %7 : vector<8x8xf32>
    %c0_8 = arith.constant 0 : index
    %c0_9 = arith.constant 0 : index
    %c0_10 = arith.constant 0 : index
    %c0_11 = arith.constant 0 : index
    %9 = vector.load %arg6[%c0_8, %c0_9, %c0_10, %c0_11] : memref<1x1x8x8xf32, #tpu.memory_space<vmem>>, vector<1x1x8x8xf32>
    %10 = vector.shape_cast %9 : vector<1x1x8x8xf32> to vector<8x8xf32>
    %11 = vector.shape_cast %8 : vector<8x8xf32> to vector<1x1x8x8xf32>
    tpu.vector_store %arg6[%c0_8, %c0_9, %c0_10, %c0_11], %11 {strides = array<i32>} : memref<1x1x8x8xf32, #tpu.memory_space<vmem>>, vector<1x1x8x8xf32>,
    return
  }
  func.func @transform_0(%arg0: i32, %arg1: i32, %arg2: i32) -> (i32, i32, i32) {
    %c0_i32 = arith.constant 0 : i32
    %c0_i32_0 = arith.constant 0 : i32
    return %arg0, %arg2, %c0_i32 : i32, i32, i32
  }
  func.func @transform_1(%arg0: i32, %arg1: i32, %arg2: i32) -> (i32, i32, i32) {
    %c0_i32 = arith.constant 0 : i32
    %c0_i32_0 = arith.constant 0 : i32
    %c0_i32_1 = arith.constant 0 : i32
    return %arg1, %c0_i32, %c0_i32_0 : i32, i32, i32
  }
  func.func @transform_2(%arg0: i32, %arg1: i32, %arg2: i32) -> (i32, i32, i32) {
    %c0_i32 = arith.constant 0 : i32
    %c0_i32_0 = arith.constant 0 : i32
    %c0_i32_1 = arith.constant 0 : i32
    return %arg1, %c0_i32, %c0_i32_0 : i32, i32, i32
  }
  func.func @transform_3(%arg0: i32, %arg1: i32, %arg2: i32) -> (i32, i32, i32, i32) {
    %c0_i32 = arith.constant 0 : i32
    %c0_i32_0 = arith.constant 0 : i32
    return %arg0, %arg1, %arg2, %c0_i32 : i32, i32, i32, i32
  }
}

</mosaic_0001>

<bundles_post_ra>
// kernel: tpu_custom_call.1
= control target key start
LH: loop header
LB: loop body
LE: loop exit
PB: predicated region body
PF: predicated region fallthrough
CT: control target
= control target key end

     0   :  { %8 = vsyncpa [#allocation3], 0  ;;  %s720_s0 = inlined_call_operand.vmem [shape: f32[2,8,32], index: 0, kind: input, shape index: {}]   ;;  %s721_s1 = inlined_call_operand.vmem [shape: f32[4,32,8], index: 1, kind: input, shape index: {}]   ;;  %s722_s2 = inlined_call_operand.vmem [shape: f32[4,1,8], index: 2, kind: input, shape index: {}]   ;;  %s723_s3 = inlined_call_operand.hbm [shape: f32[2,4,8,8], index: 3, kind: output, shape index: {}]  }
   0x1   :  { %10 = vsyncpa [#allocation3 + $0x1], 0  ;;  %s592_s12 = smov 0   ;;  %s594_s13 = smov 0  }
   0x2   :  { %s596_s14 = smov 0   ;;  %s598_s15 = smov 0  }
   0x3   :  { %s600_s16 = smov 0   ;;  %s602_s17 = smov 0  }
   0x4   :  { %s604_s18 = smov 0   ;;  %s606_s19 = smov 0  }
   0x5 LB: > { %s388_s20 = sadd.s32 4294967295, %s570_s19   ;;  %s389_s21 = sadd.s32 4294967294, %s570_s19   ;;  %s570_s19 = sphi %s606_s19, %s16_s19   ;;  %s566_s18 = sphi %s604_s18, %s732_s18   ;;  %s562_s17 = sphi %s602_s17, %s731_s17   ;;  %s558_s16 = sphi %s600_s16, %s730_s16   ;;  %s554_s15 = sphi %s598_s15, %s729_s15   ;;  %s550_s14 = sphi %s596_s14, %s728_s14   ;;  %s546_s13 = sphi %s594_s13, %s727_s13   ;;  %s542_s12 = sphi %s592_s12, %s726_s12  }
   0x6   : > { %s31_s22 = sadd.s32 1, %s562_s17  ;;  %s35_s23 = sadd.s32 1, %s566_s18 }
   0x7   : > { %p33_p0 = scmp.ge.s32.totalorder %s31_s22, 4  ;;  %p136_p1 = scmp.ne.s32.totalorder %s550_s14, %s546_s13 }
   0x8   : > { %p137_p2 = scmp.eq.s32.totalorder %s388_s20, 7  ;;  %p142_p5 = scmp.ne.s32.totalorder %s546_s13, %s542_s12 }
   0x9   : > { %s734_s22 = smov (%p33_p0, %s31_s22), 0  ;;  %s736_s23 = smov (!%p33_p0, %s35_s23), %s566_s18 }
   0xa   : > { %s120_s24 = ssub.s32 %s562_s17, %s734_s22  ;;  %p643_p3 = por %p137_p2, %p136_p1 }
   0xb   : > { %p37_p4 = scmp.ge.s32.totalorder %s736_s23, 2  ;;  %p143_p6 = scmp.eq.s32.totalorder %s389_s21, 7 }
   0xc   : > { %p392_p7 = scmp.ge.s32.totalorder %s570_s19, 1  ;;  %p185_p9 = scmp.lt.s32.totalorder %s570_s19, 9 }
   0xd   : > { %s738_s23 = smov (%p37_p4, %s736_s23), 0  ;;  %p652_p8 = por %p143_p6, %p142_p5 }
   0xe   : > { %s119_s27 = ssub.s32 %s566_s18, %s738_s23  ;;  %s126_s28 = sadd.s32 1, %s550_s14 }
   0xf   : > { %s121_s29 = sor.u32 %s120_s24, %s119_s27  ;;  %p186_p10 = pnand %p392_p7, %p185_p9 }
  0x10   : > { %p124_p11 = scmp.eq.s32.totalorder %s121_s29, 0  ;;  %p226_p12 = scmp.lt.s32.totalorder (!%p186_p10), %s554_s15, 3 }
  0x11   : > { %189 = sbr.rel (%p186_p10) target bundleno = 165 (0xa5), region = 32  ;;  %p219_p13 = scmp.lt.s32.totalorder (!%p186_p10), %s558_s16, 1 }
  0x12   : > { %s661_s30 = scalar_select %p124_p11, %s550_s14, %s126_s28  }
  0x13   : > { %s399_s29 = sshll.u32 (!%p186_p10), %s558_s16, 2 }
  0x16   : > { %s227_s4 = scalar_select %p226_p12, %s554_s15, 3  ;;  %vm243_vm0 = vcmask 261120   ;;  %vm267_vm1 = vcmask 64512  }
  0x17   : > { %s220_s5 = scalar_select %p219_p13, %s558_s16, 1 }
  0x18   : > { %s403_s6 = sshll.u32 %s227_s4, 5  ;;  %s233_s9 = scalar_lea.vmem %s722_s2, %s227_s4 }
  0x19   : > { %s230_s20 = scalar_lea.vmem %s721_s1, %s403_s6  ;;  %s394_s21 = sshll.u32 %s220_s5, 3  ;;  %v475_v5 = vld [vmem:[%s233_s9] ss:$0 sm:$0xff] }
  0x1a   : > { %v238_v0 = vld [vmem:[%s230_s20 + $0x18] sm:$0xff]  ;;  %v237_v1 = vld [vmem:[%s230_s20 + $0x10] sm:$0xff]  ;;  %v236_v2 = vld [vmem:[%s230_s20 + $0x8] sm:$0xff]  ;;  %s225_s28 = scalar_lea.vmem %s720_s0, %s394_s21  ;;  %s216_s4 = sand.u32 1, %s546_s13  }
  0x1b   : > { %259 = vmatpush.msra.mxu0 %v238_v0  ;;  %v235_v3 = vld [vmem:[%s230_s20] sm:$0xff]  ;;  %s281_s6 = sadd.s32 %s554_s15, %s399_s29  ;;  %s393_s7 = sshll.u32 %s216_s4, 3 }
  0x1c   : > { %v234_v4 = vld [vmem:[%s225_s28] sm:$0xff]  ;;  %s400_s5 = sshll.u32 %s281_s6, 3  ;;  %s218_s24 = scalar_lea.vmem [#allocation2], %s393_s7 }
  0x1d   : > { %260 = vmatpush.msra.mxu0 %v237_v1  ;;  %s283_s11 = scalar_lea.hbm %s723_s3, %s400_s5  ;;  %s285_s21 = sshll.u32 %s218_s24, 4  ;;  %s286_s21 = int_to_ptr.vmem [resolvable:$true] %s285_s21 }
  0x1e   : > { %s287_s27 = sshll.u32 %s283_s11, 4  ;;  %s270_s16 = scalar_lea.sflag [#allocation3], %s216_s4  ;;  %s288_s27 = int_to_ptr.hbm [resolvable:$true] %s287_s27 }
  0x1f   : > { %261 = vmatpush.msra.mxu0 %v236_v2  ;;  %s490_s20 = sshra.s32 %s288_s27, 4  ;;  %s496_s9 = scalar_lea.hbm %s723_s3, 64  ;;  %s491_s20 = int_to_ptr.hbm [resolvable:$true] %s490_s20 }
  0x20   : > { %s492_s15 = scalar_lea.hbm %s491_s20, 8  ;;  %p497_p4 = scmp.lt.s32.totalorder %s491_s20, %s723_s3 }
  0x21   : > { %262 = vmatpush.msra.mxu0 %v235_v3  ;;  %p493_p0 = scmp.ne.s32.totalorder %s491_s20, %s492_s15  ;;  %p498_p5 = scmp.lt.s32.totalorder %s496_s9, %s492_s15 }
  0x22   : > { %397 = vmatmul.msk.f32.vlgmr.msra.gmra.mxu0 %vm243_vm0, %v234_v4 }
  0x23   : > { %p494_p1 = pnand %p493_p0, %p643_p3  ;;  %p499_p6 = por %p498_p5, %p497_p4 }
  0x25   : > { %p495_p2 = pneg %p494_p1 }
  0x27   : > { %p500_p7 = pnand %p499_p6, %p495_p2 }
  0x9f   : > { %v264_v6 = vpop.f32.mrf.mxu0 }
  0xa0   : > { %v265_v7 = vadd.f32 %v475_v5, %v264_v6 }
  0xa2   : > { %268 = vst.msk [vmem:[%s218_s24] sm:$0xff] %vm267_vm1, %v265_v7 }
  0xa3   : > { %503 = shalt.err (!%p500_p7)
}
  0xa4   : > { %404 = dma.vmem_to_hbm [thread:$0]  (%p643_p3), %s286_s21, 128, %s288_s27, %s270_s16  }
  0xa5 PF: > { %p410_p9 = scmp.ge.s32.totalorder %s570_s19, 2  ;;  %s299_s4 = sand.u32 1, %s542_s12  }
  0xa6   : > { %s300_s5 = scalar_lea.sflag [#allocation3], %s299_s4 }
  0xa7   : > { %p407_p10 = pnand %p410_p9, %p652_p8 }
  0xa9   : > { %p408_p11 = pneg %p407_p10 }
  0xab   : > { %537 = dma.done.wait (%p408_p11), %s300_s5, 128  }
  0xac   : > { %539 = vsyncadd (%p408_p11), %s300_s5, 4294967168  ;;  %s16_s19 = sadd.s32 1, %s570_s19   ;;  %s726_s12 = smov %s546_s13 }
  0xad   : > { %p13_p12 = scmp.ge.s32.totalorder %s16_s19, 10   ;;  %s727_s13 = smov %s550_s14 }
  0xae   : > { %s728_s14 = smov %s661_s30  ;;  %s729_s15 = smov %s562_s17 }
  0xaf   : > { %s730_s16 = smov %s566_s18  ;;  %s731_s17 = smov %s734_s22 }
  0xb0   : > { %s732_s18 = smov %s738_s23  ;;  %15 = sbr.rel (!%p13_p12) target bundleno = 5 (0x5), region = 73 }
  0xb5   :  { %306 = vsyncpa [#allocation3], 1 }
  0xb6   :  { %308 = vsyncpa [#allocation3 + $0x1], 1 }

</bundles_post_ra>
